<compile_context>
chip_gen: v6e
topology: v6e:2x2x1
jax: 0.10.0
libtpu: 0.0.40
codegen_flags: <defaults>
</compile_context>

<pallas_src>
import functools
import math

import jax
import jax.numpy as jnp
from jax.experimental import pallas as pl
from jax.experimental.pallas import tpu as pltpu


def _mha_kernel(x_ref, w_attn_ref, b_attn_ref, w_proj_ref, o_ref, *,
                n_heads: int, head_size: int, seq_len: int):
    # x_ref:      (1, T, C_in)        bf16
    # w_attn_ref: (C_in, 3*Ckqv)      bf16
    # b_attn_ref: (1, 3*Ckqv)         f32
    # w_proj_ref: (H, hs, C_out)      bf16   (head-split projection weight)
    # o_ref:      (1, T, C_out)       x.dtype
    H, hs, T = n_heads, head_size, seq_len
    inv_sqrt_hs = 1.0 / math.sqrt(hs)

    x = x_ref[0]                                                # (T, C_in) bf16

    # Single lane-dense QKV projection (bf16 in, f32 accumulate), f32 bias add.
    qkv = jnp.dot(x, w_attn_ref[...],
                  preferred_element_type=jnp.float32)           # (T, 3*Ckqv) f32
    qkv = qkv + b_attn_ref[...]                                 # broadcast (1, 3*Ckqv)

    # Split heads on leading (non-lane) dims: one reshape + one major-dim
    # transpose (lane dim stays put), then free leading-dim slices.
    qkv_h = qkv.astype(jnp.bfloat16).reshape(T, 3 * H, hs)
    qkv_h = jnp.transpose(qkv_h, (1, 0, 2))                     # (3H, T, hs) bf16
    q = qkv_h[0 * H:1 * H] * inv_sqrt_hs                        # (H, T, hs), pre-scaled
    k = qkv_h[1 * H:2 * H]                                      # (H, T, hs)
    v = qkv_h[2 * H:3 * H]                                      # (H, T, hs)

    # Head-batched scores: batch dim = head, contract over head_size.
    # (No explicit k transpose; dot_general consumes k in natural layout.)
    s = jax.lax.dot_general(q, k, (((2,), (2,)), ((0,), (0,))),
                            preferred_element_type=jnp.float32)  # (H, T, T) f32

    # Softmax with f32 statistics; approx reciprocal uses the EUP slot.
    m = jnp.max(s, axis=-1, keepdims=True)
    p = jnp.exp(s - m)
    l = jnp.sum(p, axis=-1, keepdims=True)
    p = (p * pl.reciprocal(l, approx=True)).astype(jnp.bfloat16)  # (H, T, T) bf16

    # att @ v, head-batched, bf16 inputs / f32 accumulation.
    y = jax.lax.dot_general(p, v, (((2,), (1,)), ((0,), (0,))),
                            preferred_element_type=jnp.float32)  # (H, T, hs) f32

    # Output projection with the head-concat folded in:
    # (H, T, hs) x (H, hs, C_out) -> (H, T, C_out), then reduce over heads.
    y = y.astype(jnp.bfloat16)
    out_h = jax.lax.dot_general(y, w_proj_ref[...],
                                (((2,), (1,)), ((0,), (0,))),
                                preferred_element_type=jnp.float32)  # (H, T, C_out)
    out = jnp.sum(out_h, axis=0)                                # (T, C_out) f32

    o_ref[0] = out.astype(o_ref.dtype)


def multi_headed_attention(x, w_attn, b_attn, w_proj, *, n_heads: int):
    """x: (B, T, C_in); returns (B, T, C_out)."""
    B, T, C_in = x.shape
    three_ckqv = w_attn.shape[1]
    n_embed_kqv = three_ckqv // 3
    C_out = w_proj.shape[1]
    assert n_embed_kqv % n_heads == 0
    head_size = n_embed_kqv // n_heads

    # bf16 matmul inputs (native fast MXU path on v5e/v6e/v7x); f32 bias,
    # f32 accumulation inside the kernel.
    x_bf = x.astype(jnp.bfloat16)
    w_attn_bf = w_attn.astype(jnp.bfloat16)
    b_attn_2d = b_attn.reshape(1, three_ckqv).astype(jnp.float32)
    # Fold the head concat into the projection: (Ckqv, C_out) -> (H, hs, C_out).
    w_proj_heads = w_proj.reshape(n_heads, head_size, C_out).astype(jnp.bfloat16)

    kernel = functools.partial(
        _mha_kernel, n_heads=n_heads, head_size=head_size, seq_len=T)

    flops = (2 * B * T * C_in * three_ckqv                     # QKV projection
             + 2 * 2 * B * n_heads * T * T * head_size         # scores + att@v
             + 2 * B * T * n_embed_kqv * C_out)                # output projection
    bytes_accessed = (x_bf.size * 2 + w_attn_bf.size * 2 + b_attn_2d.size * 4
                      + w_proj_heads.size * 2
                      + B * T * C_out * x.dtype.itemsize)
    cost = pl.CostEstimate(flops=flops,
                           transcendentals=B * n_heads * T * T,
                           bytes_accessed=bytes_accessed)

    return pl.pallas_call(
        kernel,
        out_shape=jax.ShapeDtypeStruct((B, T, C_out), x.dtype),
        grid_spec=pltpu.PrefetchScalarGridSpec(
            num_scalar_prefetch=0,
            grid=(B,),
            in_specs=[
                pl.BlockSpec((1, T, C_in), lambda b: (b, 0, 0)),
                pl.BlockSpec((C_in, three_ckqv), lambda b: (0, 0)),
                pl.BlockSpec((1, three_ckqv), lambda b: (0, 0)),
                pl.BlockSpec((n_heads, head_size, C_out), lambda b: (0, 0, 0)),
            ],
            out_specs=pl.BlockSpec((1, T, C_out), lambda b: (b, 0, 0)),
        ),
        compiler_params=pltpu.CompilerParams(
            dimension_semantics=("parallel",)),
        cost_estimate=cost,
    )(x_bf, w_attn_bf, b_attn_2d, w_proj_heads)


def _reference(x, w_attn, b_attn, w_proj, *, n_heads: int):
    """Plain-JAX f32 reference reproducing the PyTorch forward (eval mode)."""
    B, T, C_in = x.shape
    n_embed_kqv = w_attn.shape[1] // 3
    head_size = n_embed_kqv // n_heads
    qkv = jnp.einsum('bti,ij->btj', x, w_attn) + b_attn
    q, k, v = jnp.split(qkv, 3, axis=-1)

    def to_heads(t):
        return t.reshape(B, T, n_heads, head_size).transpose(0, 2, 1, 3)

    q, k, v = to_heads(q), to_heads(k), to_heads(v)
    att = jnp.einsum('bhqd,bhkd->bhqk', q, k) / math.sqrt(head_size)
    att = jax.nn.softmax(att, axis=-1)
    y = jnp.einsum('bhqk,bhkd->bhqd', att, v)
    y = y.transpose(0, 2, 1, 3).reshape(B, T, n_embed_kqv)
    return jnp.einsum('bti,ij->btj', y, w_proj)


if __name__ == "__main__":
    # Small deterministic config:
    #   n_embed_in=32, n_embed_kqv=32, n_embed_out=32, n_heads=4 (head_size=8)
    B, T = 2, 8
    n_embed_in, n_embed_kqv, n_embed_out, n_heads = 32, 32, 32, 4
    init_std = 0.02

    key = jax.random.PRNGKey(0)
    kx, kw1, kb1, kw2 = jax.random.split(key, 4)

    x = jax.random.normal(kx, (B, T, n_embed_in), dtype=jnp.float32)
    w_attn = init_std * jax.random.normal(
        kw1, (n_embed_in, 3 * n_embed_kqv), dtype=jnp.float32)
    b_attn = init_std * jax.random.normal(
        kb1, (3 * n_embed_kqv,), dtype=jnp.float32)
    w_proj = init_std * jax.random.normal(
        kw2, (n_embed_kqv, n_embed_out), dtype=jnp.float32)

    out = multi_headed_attention(x, w_attn, b_attn, w_proj, n_heads=n_heads)
    out = jax.block_until_ready(out)

    ref = _reference(x, w_attn, b_attn, w_proj, n_heads=n_heads)
    assert out.shape == (B, T, n_embed_out)
    # bf16 matmul inputs + approx reciprocal vs f32 reference -> relaxed tol.
    assert jnp.allclose(out, ref, atol=5e-4, rtol=2e-2), (
        float(jnp.max(jnp.abs(out - ref))))

    print("KERNEL_OK")
</pallas_src>

<mosaic_0001>
module attributes {stable_mosaic.version = 11 : i64} {
  func.func @_mha_kernel(%arg0: i32, %arg1: memref<1x8x32xbf16, #tpu.memory_space<vmem>>, %arg2: memref<32x96xbf16, #tpu.memory_space<vmem>>, %arg3: memref<1x96xf32, #tpu.memory_space<vmem>>, %arg4: memref<4x8x32xbf16, #tpu.memory_space<vmem>>, %arg5: memref<1x8x32xf32, #tpu.memory_space<vmem>>) attributes {dimension_semantics = [#tpu.dimension_semantics<parallel>], iteration_bounds = array<i64: 2>, scalar_prefetch = 0 : i64, scratch_operands = 0 : i64, tpu.core_type = #tpu.core_type<tc>, window_params = [{transform_indices = @transform_0, window_bounds = array<i64: 1, 8, 32>}, {pipeline_mode = #tpu.pipeline_mode<synchronous>, transform_indices = @transform_1, window_bounds = array<i64: 32, 96>}, {pipeline_mode = #tpu.pipeline_mode<synchronous>, transform_indices = @transform_2, window_bounds = array<i64: 1, 96>}, {pipeline_mode = #tpu.pipeline_mode<synchronous>, transform_indices = @transform_3, window_bounds = array<i64: 4, 8, 32>}, {transform_indices = @transform_4, window_bounds = array<i64: 1, 8, 32>}]} {
    %c0 = arith.constant 0 : index
    %c0_0 = arith.constant 0 : index
    %c0_1 = arith.constant 0 : index
    %0 = vector.load %arg1[%c0, %c0_0, %c0_1] : memref<1x8x32xbf16, #tpu.memory_space<vmem>>, vector<1x8x32xbf16>
    %1 = vector.shape_cast %0 : vector<1x8x32xbf16> to vector<8x32xbf16>
    %c0_2 = arith.constant 0 : index
    %c0_3 = arith.constant 0 : index
    %2 = vector.load %arg2[%c0_2, %c0_3] : memref<32x96xbf16, #tpu.memory_space<vmem>>, vector<32x96xbf16>
    %cst = arith.constant dense<0.000000e+00> : vector<8x96xf32>
    %3 = tpu.matmul %1, %2, %cst {dimension_numbers = #tpu.dot_dimension_numbers<[1], [0], [0], [1], [0, 0, 1, 1], [], []>} : vector<8x32xbf16>, vector<32x96xbf16>, vector<8x96xf32> -> vector<8x96xf32>
    %c0_4 = arith.constant 0 : index
    %c0_5 = arith.constant 0 : index
    %4 = vector.load %arg3[%c0_4, %c0_5] : memref<1x96xf32, #tpu.memory_space<vmem>>, vector<1x96xf32>
    %5 = vector.broadcast %4 : vector<1x96xf32> to vector<8x96xf32>
    %6 = arith.addf %3, %5 : vector<8x96xf32>
    %7 = arith.truncf %6 : vector<8x96xf32> to vector<8x96xbf16>
    %8 = vector.shape_cast %7 : vector<8x96xbf16> to vector<8x12x8xbf16>
    %9 = tpu.transpose %8, [1, 0, 2] : vector<8x12x8xbf16> -> vector<12x8x8xbf16>
    %10 = vector.extract_strided_slice %9 {offsets = [0, 0, 0], sizes = [4, 8, 8], strides = [1, 1, 1]} : vector<12x8x8xbf16> to vector<4x8x8xbf16>
    %cst_6 = arith.constant 3.535160e-01 : bf16
    %11 = vector.broadcast %cst_6 : bf16 to vector<4x8x8xbf16>
    %12 = arith.mulf %10, %11 : vector<4x8x8xbf16>
    %13 = vector.extract_strided_slice %9 {offsets = [4, 0, 0], sizes = [4, 8, 8], strides = [1, 1, 1]} : vector<12x8x8xbf16> to vector<4x8x8xbf16>
    %14 = vector.extract_strided_slice %9 {offsets = [8, 0, 0], sizes = [4, 8, 8], strides = [1, 1, 1]} : vector<12x8x8xbf16> to vector<4x8x8xbf16>
    %cst_7 = arith.constant dense<0.000000e+00> : vector<4x8x8xf32>
    %15 = tpu.matmul %12, %13, %cst_7 {dimension_numbers = #tpu.dot_dimension_numbers<[2], [2], [1], [1], [0, 0, 0, 1, 1, 1], [0], [0]>} : vector<4x8x8xbf16>, vector<4x8x8xbf16>, vector<4x8x8xf32> -> vector<4x8x8xf32>
    %cst_8 = arith.constant dense<0xFF800000> : vector<4x8xf32>
    %16 = vector.multi_reduction <maximumf>, %15, %cst_8 [2] : vector<4x8x8xf32> to vector<4x8xf32>
    %17 = vector.shape_cast %16 : vector<4x8xf32> to vector<4x8x1xf32>
    %18 = vector.broadcast %17 : vector<4x8x1xf32> to vector<4x8x8xf32>
    %19 = arith.subf %15, %18 : vector<4x8x8xf32>
    %20 = math.exp %19 : vector<4x8x8xf32>
    %cst_9 = arith.constant dense<0.000000e+00> : vector<4x8xf32>
    %21 = vector.multi_reduction <add>, %20, %cst_9 [2] : vector<4x8x8xf32> to vector<4x8xf32>
    %22 = vector.shape_cast %21 : vector<4x8xf32> to vector<4x8x1xf32>
    %23 = tpu.reciprocal %22 {approx = true} : vector<4x8x1xf32> -> vector<4x8x1xf32>
    %24 = vector.broadcast %23 : vector<4x8x1xf32> to vector<4x8x8xf32>
    %25 = arith.mulf %20, %24 : vector<4x8x8xf32>
    %26 = arith.truncf %25 : vector<4x8x8xf32> to vector<4x8x8xbf16>
    %cst_10 = arith.constant dense<0.000000e+00> : vector<4x8x8xf32>
    %27 = tpu.matmul %26, %14, %cst_10 {dimension_numbers = #tpu.dot_dimension_numbers<[2], [1], [1], [2], [0, 0, 0, 1, 1, 2], [0], [0]>} : vector<4x8x8xbf16>, vector<4x8x8xbf16>, vector<4x8x8xf32> -> vector<4x8x8xf32>
    %28 = arith.truncf %27 : vector<4x8x8xf32> to vector<4x8x8xbf16>
    %c0_11 = arith.constant 0 : index
    %c0_12 = arith.constant 0 : index
    %c0_13 = arith.constant 0 : index
    %29 = vector.load %arg4[%c0_11, %c0_12, %c0_13] : memref<4x8x32xbf16, #tpu.memory_space<vmem>>, vector<4x8x32xbf16>
    %cst_14 = arith.constant dense<0.000000e+00> : vector<4x8x32xf32>
    %30 = tpu.matmul %28, %29, %cst_14 {dimension_numbers = #tpu.dot_dimension_numbers<[2], [1], [1], [2], [0, 0, 0, 1, 1, 2], [0], [0]>} : vector<4x8x8xbf16>, vector<4x8x32xbf16>, vector<4x8x32xf32> -> vector<4x8x32xf32>
    %cst_15 = arith.constant dense<0.000000e+00> : vector<8x32xf32>
    %31 = vector.multi_reduction <add>, %30, %cst_15 [0] : vector<4x8x32xf32> to vector<8x32xf32>
    %c0_16 = arith.constant 0 : index
    %c0_17 = arith.constant 0 : index
    %c0_18 = arith.constant 0 : index
    %32 = vector.load %arg5[%c0_16, %c0_17, %c0_18] : memref<1x8x32xf32, #tpu.memory_space<vmem>>, vector<1x8x32xf32>
    %33 = vector.shape_cast %32 : vector<1x8x32xf32> to vector<8x32xf32>
    %34 = vector.shape_cast %31 : vector<8x32xf32> to vector<1x8x32xf32>
    tpu.vector_store %arg5[%c0_16, %c0_17, %c0_18], %34 {strides = array<i32>} : memref<1x8x32xf32, #tpu.memory_space<vmem>>, vector<1x8x32xf32>,
    return
  }
  func.func @transform_0(%arg0: i32) -> (i32, i32, i32) {
    %c0_i32 = arith.constant 0 : i32
    %c0_i32_0 = arith.constant 0 : i32
    %c0_i32_1 = arith.constant 0 : i32
    return %arg0, %c0_i32, %c0_i32_0 : i32, i32, i32
  }
  func.func @transform_1(%arg0: i32) -> (i32, i32) {
    %c0_i32 = arith.constant 0 : i32
    %c0_i32_0 = arith.constant 0 : i32
    %c0_i32_1 = arith.constant 0 : i32
    return %c0_i32, %c0_i32_0 : i32, i32
  }
  func.func @transform_2(%arg0: i32) -> (i32, i32) {
    %c0_i32 = arith.constant 0 : i32
    %c0_i32_0 = arith.constant 0 : i32
    %c0_i32_1 = arith.constant 0 : i32
    return %c0_i32, %c0_i32_0 : i32, i32
  }
  func.func @transform_3(%arg0: i32) -> (i32, i32, i32) {
    %c0_i32 = arith.constant 0 : i32
    %c0_i32_0 = arith.constant 0 : i32
    %c0_i32_1 = arith.constant 0 : i32
    %c0_i32_2 = arith.constant 0 : i32
    return %c0_i32, %c0_i32_0, %c0_i32_1 : i32, i32, i32
  }
  func.func @transform_4(%arg0: i32) -> (i32, i32, i32) {
    %c0_i32 = arith.constant 0 : i32
    %c0_i32_0 = arith.constant 0 : i32
    %c0_i32_1 = arith.constant 0 : i32
    return %arg0, %c0_i32, %c0_i32_0 : i32, i32, i32
  }
}

</mosaic_0001>

<bundles_post_ra>
// kernel: tpu_custom_call.1
= control target key start
LH: loop header
LB: loop body
LE: loop exit
PB: predicated region body
PF: predicated region fallthrough
CT: control target
= control target key end

     0   :  { %9 = vsyncpa [#allocation3], 0  ;;  %s2140_s0 = inlined_call_operand.hbm [shape: bf16[2,8,32], index: 0, kind: input, shape index: {}]   ;;  %s2141_s1 = inlined_call_operand.hbm [shape: bf16[32,96], index: 1, kind: input, shape index: {}]   ;;  %s2142_s2 = inlined_call_operand.vmem [shape: f32[1,96], index: 2, kind: input, shape index: {}]   ;;  %s2143_s3 = inlined_call_operand.hbm [shape: bf16[4,8,32], index: 3, kind: input, shape index: {}]   ;;  %s2144_s4 = inlined_call_operand.hbm [shape: f32[2,8,32], index: 4, kind: output, shape index: {}]  }
   0x1   :  { %11 = vsyncpa [#allocation3 + $0x1], 0 }
   0x2   :  { %12 = vsyncpa [#allocation6], 0 }
   0x3   :  { %13 = vsyncpa [#allocation4], 0 }
   0x4   :  { %15 = vsyncpa [#allocation4 + $0x1], 0  ;;  %s1833_s15 = smov 0   ;;  %s1835_s16 = smov 0  }
   0x5   :  { %s1837_s17 = smov 0   ;;  %s1839_s18 = smov 0  }
   0x6 LB: > { %s1854_s19 = sadd.s32 4294967295, %s1784_s18   ;;  %s1394_s20 = sadd.s32 4294967294, %s1784_s18   ;;  %s1784_s18 = sphi %s1839_s18, %s2166_s18   ;;  %s1780_s17 = sphi %s1837_s17, %s2165_s17   ;;  %s1776_s16 = sphi %s1835_s16, %s2164_s16   ;;  %s1772_s15 = sphi %s1833_s15, %s2163_s15  }
   0x7   : > { %p41_p0 = scmp.ne.s32.totalorder %s1776_s16, %s1772_s15  ;;  %p2145_p1 = scmp.eq.s32.totalorder %s1854_s19, 0 }
   0x8   : > { %p134_p3 = scmp.eq.s32.totalorder %s1394_s20, 1  ;;  %p1395_p5 = scmp.ge.s32.totalorder %s1784_s18, 1 }
   0x9   : > { %p1863_p4 = por %p2145_p1, %p41_p0  ;;  %p141_p7 = scmp.lt.s32.totalorder %s1784_s18, 3 }
   0xa   : > { %p1868_p6 = por %p134_p3, %p41_p0  ;;  %s1786_s24 = smov [#allocation5]  }
   0xb   : > { %s2149_s21 = scalar_select %p1863_p4, 1, 0 }
   0xc   : > { %s2150_s22 = scalar_select %p1868_p6, 1, 0 }
   0xd   : > { %p1873_p8 = pnand %p1395_p5, %p141_p7  ;;  %s153_s25 = sshll.u32 %s1786_s24, 4  ;;  %s154_s25 = int_to_ptr.vmem [resolvable:$true] %s153_s25 }
   0xe   : > { %s1787_s27 = smov [#allocation7]   ;;  %s1647_s29 = scalar_lea.vmem %s154_s25, 256 }
   0xf   : > { %s2151_s23 = scalar_select %p1873_p8, 1, 0 }
  0x10   : > { %p1545_p9 = pneg %p1873_p8  ;;  %s169_s28 = sshll.u32 %s1787_s27, 4  ;;  %s170_s28 = int_to_ptr.vmem [resolvable:$true] %s169_s28 }
  0x11   : > { %p1648_p13 = scmp.ne.s32.totalorder %s154_s25, %s1647_s29  ;;  %p1655_p5 = scmp.lt.s32.totalorder %s154_s25, %s154_s25 }
  0x12   : > { %p1882_p11 = pnand %p1545_p9, %p2145_p1  ;;  %p1656_p7 = scmp.lt.s32.totalorder %s1647_s29, %s1647_s29 }
  0x14   : > { %p1638_p12 = pneg %p1882_p11  ;;  %p1657_p10 = por %p1656_p7, %p1655_p5 }
  0x16   : > { %p1650_p0 = pnand %p1648_p13, %p1638_p12 }
  0x18   : > { %p1651_p3 = pneg %p1650_p0 }
  0x1a   : > { %p1658_p9 = pnand %p1657_p10, %p1651_p3 }
  0x1c   : > { %1661 = shalt.err (!%p1658_p9)
}
  0x1d   : > { %s1788_s30 = smov 64   ;;  %s1789_s5 = smov 4  }
  0x1e   : > { %1548 = dma.hbm_to_vmem [thread:$0]  (!%p1882_p11), %s2141_s1, 256, %s154_s25, [#allocation6], %s1788_s30, %s1788_s30, %s1789_s5  }
  0x1f   : > { %s1673_s8 = scalar_lea.vmem %s170_s28, 256  ;;  %p1681_p2 = scmp.lt.s32.totalorder %s170_s28, %s170_s28 }
  0x20   : > { %p1674_p1 = scmp.ne.s32.totalorder %s170_s28, %s1673_s8  ;;  %p1682_p6 = scmp.lt.s32.totalorder %s1673_s8, %s1673_s8 }
  0x22   : > { %p1676_p13 = pnand %p1674_p1, %p1638_p12  ;;  %p1683_p5 = por %p1682_p6, %p1681_p2 }
  0x24   : > { %p1677_p0 = pneg %p1676_p13 }
  0x26   : > { %p1684_p10 = pnand %p1683_p5, %p1677_p0 }
  0x28   : > { %1687 = shalt.err (!%p1684_p10)
}
  0x29   : > { %1551 = dma.hbm_to_vmem [thread:$0]  (!%p1882_p11), %s2143_s3, 256, %s170_s28, [#allocation6], %s1788_s30, %s1788_s30, %s1789_s5  }
  0x2a   : > { %s1905_s11 = sadd.s32 1, %s1784_s18   ;;  %s28_s12 = sadd.s32 1, %s1780_s17 }
  0x2b   : > { %s25_s13 = ssub.s32 %s1784_s18, %s1905_s11  ;;  %p35_p1 = scmp.ne.s32.totalorder %s1780_s17, %s1776_s16 }
  0x2c   : > { %p26_p2 = scmp.eq.s32.totalorder %s25_s13, 0  ;;  %p36_p6 = scmp.eq.s32.totalorder %s1784_s18, 0 }
  0x2d   : > { %p2153_p12 = scmp.eq.s32.totalorder %s1854_s19, 1  ;;  %p1562_p7 = scmp.lt.s32.totalorder %s1784_s18, 2 }
  0x2e   : > { %s1921_s20 = scalar_select %p26_p2, %s1780_s17, %s28_s12  }
  0x2f   : > { %p1915_p3 = por %p2153_p12, %p35_p1  ;;  %p37_p9 = por %p36_p6, %p35_p1 }
  0x30   : > { %s183_s24 = sand.u32 1, %s1780_s17   ;;  %s1400_s26 = sshll.u32 %s1784_s18, 6 }
  0x31   : > { %s2154_s14 = scalar_select %p1915_p3, 1, 0 }
  0x32   : > { %s1399_s25 = sshll.u32 %s183_s24, 2  ;;  %s1928_s29 = scalar_lea.hbm %s2140_s0, %s1400_s26 }
  0x33   : > { %s187_s30 = scalar_lea.vmem [#allocation2], %s1399_s25  ;;  %p1930_p11 = pnand %p1562_p7, %p37_p9 }
  0x34   : > { %s194_s5 = sshll.u32 %s187_s30, 4  ;;  %s184_s7 = scalar_lea.sflag [#allocation3], %s183_s24  ;;  %s195_s5 = int_to_ptr.vmem [resolvable:$true] %s194_s5 }
  0x35   : > { %s1688_s8 = scalar_lea.hbm %s1928_s29, 64  ;;  %p1690_p0 = pneg %p1930_p11 }
  0x36   : > { %p1689_p13 = scmp.ne.s32.totalorder %s1928_s29, %s1688_s8  ;;  %s1693_s12 = scalar_lea.hbm %s2140_s0, 128 }
  0x37   : > { %p1694_p1 = scmp.lt.s32.totalorder %s1928_s29, %s2140_s0  ;;  %p1695_p2 = scmp.lt.s32.totalorder %s1693_s12, %s1688_s8 }
  0x38   : > { %p1691_p5 = pnand %p1690_p0, %p1689_p13 }
  0x39   : > { %p1696_p6 = por %p1695_p2, %p1694_p1 }
  0x3a   : > { %p1692_p10 = pneg %p1691_p5 }
  0x3c   : > { %p1697_p12 = pnand %p1696_p6, %p1692_p10 }
  0x3e   : > { %1700 = shalt.err (!%p1697_p12)
}
  0x3f   : > { %s1701_s26 = scalar_lea.vmem %s195_s5, 64  ;;  %s1790_s24 = smov [#allocation2]  }
  0x40   : > { %p1702_p7 = scmp.ne.s32.totalorder %s195_s5, %s1701_s26  ;;  %s1706_s27 = sshll.u32 %s1790_s24, 4  ;;  %s1707_s27 = int_to_ptr.vmem [resolvable:$false] %s1706_s27 }
  0x41   : > { %s1708_s28 = scalar_lea.vmem %s1707_s27, 128  ;;  %p1709_p13 = scmp.lt.s32.totalorder %s195_s5, %s1707_s27 }
  0x42   : > { %p1704_p9 = pnand %p1702_p7, %p1690_p0  ;;  %p1710_p5 = scmp.lt.s32.totalorder %s1708_s28, %s1701_s26 }
  0x44   : > { %p1705_p3 = pneg %p1704_p9  ;;  %p1711_p4 = por %p1710_p5, %p1709_p13 }
  0x46   : > { %p1712_p8 = pnand %p1711_p4, %p1705_p3 }
  0x48   : > { %1715 = shalt.err (!%p1712_p8)
}
  0x49   : > { %1555 = dma.hbm_to_vmem [thread:$0]  (!%p1930_p11), %s1928_s29, 64, %s195_s5, %s184_s7  }
  0x4a   : > { %p2156_p10 = scmp.ne.s32.totalorder %s2151_s23, 0 }
  0x4b   : > { %s1951_s30 = sand.u32 (!%p2156_p10), 1, %s1776_s16   ;;  %p2157_p0 = scmp.ne.s32.totalorder (!%p2156_p10), %s2149_s21, 0 }
  0x4c   : > { %203 = sbr.rel (%p2156_p10) target bundleno = 1379 (0x563), region = 36  ;;  %s1402_s8 = sshll.u32 (!%p2156_p10), %s1951_s30, 2 }
  0x4d   : > { %s206_s9 = scalar_lea.sflag (!%p2156_p10), [#allocation3], %s1951_s30  ;;  %s209_s10 = scalar_lea.vmem (!%p2156_p10), [#allocation2], %s1402_s8 }
  0x51   : > { %1759 = dma.done.wait (%p2157_p0), %s206_s9, 64  }
  0x52   : > { %1761 = vsyncadd (%p2157_p0), %s206_s9, 4294967232  ;;  %p2158_p4 = scmp.eq.s32.totalorder %s1854_s19, 0 }
  0x54   : > { %1763 = dma.done.wait (%p2158_p4), [#allocation6], 512   ;;  %p2159_p8 = pmov %p2158_p4 }
  0x55   : > { %v1791_v0 = vmov 0.0   ;;  %vm1792_vm0 = vmmov 0   ;;  %v1618_v1 = vld [vmem:[#allocation5 + $0x8] sm:$0xff]   ;;  %v1619_v2 = vld [vmem:[#allocation5] sm:$0xff]   ;;  %v244_v3 = vld [vmem:[%s209_s10] sm:$0xf]  ;;  %v347_v17 = vlaneseq }
  0x56   : > { %1765 = vsyncadd (%p2159_p8), [#allocation6], 4294966784  ;;  %1453 = vmatprep.subr.bf16.mxu0 %v1791_v0  ;;  %1457 = vmatprep.mubr.msk.bf16.mxu0 %vm1792_vm0, %v1791_v0  ;;  %vm268_vm1 = vcmask 261120   ;;  %v1406_v4 = vld [vmem:[%s2142_s2] ss:$0 sm:$0xff]  ;;  %s1793_s29 = smov 104  }
  0x57   : > { %1461 = vmatprep.subr.bf16.mxu1 %v1791_v0  ;;  %1463 = vmatprep.mubr.msk.bf16.mxu1 %vm1792_vm0, %v1791_v0  ;;  %s1794_s5 = smov 120   ;;  %s1795_s6 = smov 96   ;;  %v1804_v15 = vmov 1983009808   ;;  %v348_v21 = vshrl.u32 %v347_v17, 7  ;;  %vm673_vm2 = vcmask 64512  }
  0x58   : > { %1454 = vmatpush3.bf16.msra.mxu0 %v1618_v1  ;;  %s1796_s7 = smov 112   ;;  %s1797_s12 = smov 80   ;;  %v345_v16 = vunpack.c.l.s4 %v1804_v15  ;;  %v1805_v22 = vmov 1934713408   ;;  %vm909_vm3 = vcmask 1043456  }
  0x59   : > { %1455 = vmatprep.subr.bf16.mxu0 %v1791_v0  ;;  %s1798_s13 = smov 88   ;;  %s1799_s25 = smov 64   ;;  %v378_v23 = vunpack.c.l.s4 %v1805_v22 }
  0x5a   : > { %s1800_s26 = smov 72   ;;  %s1801_s24 = smov 48   ;;  %v346_v20 = vunpack.c.0.s8 %v345_v16 }
  0x5b   : > { %s1802_s27 = smov 56   ;;  %s1803_s28 = smov 40   ;;  %v379_v29 = vunpack.c.0.s8 %v378_v23 }
  0x5c   : > { %1456 = vmatpush3.bf16.msra.mxu0 %v1619_v2  ;;  %v1977_v27 = vsub.s32 %v346_v20, %v348_v21  ;;  %s1405_s8 = sshll.u32 %s1951_s30, 3  ;;  %s1423_s9 = sshll.u32 %s1854_s19, 7 }
  0x5d   : > { %1467 = vmatprep.subr.bf16.mxu0 %v1791_v0  ;;  %v1983_v38 = vsub.s32 %v379_v29, %v348_v21  ;;  %s241_s10 = scalar_lea.vmem [#allocation8], %s1405_s8  ;;  %s1292_s19 = scalar_lea.sflag [#allocation4], %s1951_s30 }
  0x5e   : > { %s1305_s21 = sshll.u32 %s241_s10, 4  ;;  %p2160_p11 = scmp.ne.s32.totalorder %s2154_s14, 0  ;;  %s2098_s21 = int_to_ptr.vmem [resolvable:$true] %s1305_s21 }
  0x5f   : > { %1458 = vmatmul.mubr.msk.bf16.vlgmr.msra.gmra.mxu0 %vm268_vm1, %v244_v3 }
  0x60   : > { %1469 = vmatprep.mubr.msk.bf16.mxu0 %vm1792_vm0, %v1791_v0 }
 0x11f   : > { %v306_v5 = vpop.f32.mrf.mxu0 }
 0x120   : > { %v307_v6 = vadd.f32 %v1406_v4, %v306_v5 }
 0x121   : > { %v1459_v7 = vpop.f32.mrf.mxu0 }
 0x122   : > { %v312_v8 = vpack.c.bf16 %v307_v6, %v307_v6 }
 0x123   : > { %v309_v9 = vpop.f32.mrf.mxu0 }
 0x124   : > { %320 = vrot.lane.b32.xlu1 %v312_v8, %s1793_s29  ;;  %314 = vrot.lane.b32.xlu0 %v312_v8, %s1794_s5  ;;  %s2096_s5 = scalar_lea.hbm %s2144_s4, %s1423_s9 }
 0x125   : > { %v1460_v10 = vpop.f32.mrf.mxu0 }
 0x128   : > { %323 = vrot.lane.b32.xlu1 %v312_v8, %s1795_s6  ;;  %317 = vrot.lane.b32.xlu0 %v312_v8, %s1796_s7  ;;  %s1716_s6 = scalar_lea.vmem %s2098_s21, 128  ;;  %s1807_s7 = smov [#allocation8]  }
 0x129   : > { %p1717_p3 = scmp.ne.s32.totalorder %s2098_s21, %s1716_s6 }
 0x12b   : > { %p1718_p1 = pnand %p1717_p3, %p2160_p11 }
 0x12c   : > { %329 = vrot.lane.b32.xlu1 %v312_v8, %s1797_s12  ;;  %326 = vrot.lane.b32.xlu0 %v312_v8, %s1798_s13  ;;  %s1720_s12 = sshll.u32 %s1807_s7, 4  ;;  %s1721_s12 = int_to_ptr.vmem [resolvable:$false] %s1720_s12 }
 0x12d   : > { %p1719_p2 = pneg %p1718_p1  ;;  %s1722_s13 = scalar_lea.vmem %s1721_s12, 256 }
 0x12e   : > { %p1723_p6 = scmp.lt.s32.totalorder %s2098_s21, %s1721_s12  ;;  %p1724_p12 = scmp.lt.s32.totalorder %s1722_s13, %s1716_s6 }
 0x130   : > { %335 = vrot.lane.b32.xlu1 %v312_v8, %s1799_s25  ;;  %332 = vrot.lane.b32.xlu0 %v312_v8, %s1800_s26  ;;  %p1725_p7 = por %p1724_p12, %p1723_p6 }
 0x132   : > { %p1726_p9 = pnand %p1725_p7, %p1719_p2 }
 0x134   : > { %339 = vrot.lane.b32.xlu1 %v312_v8, %s1801_s24  ;;  %337 = vrot.lane.b32.xlu0 %v312_v8, %s1802_s27 }
 0x138   : > { %341 = vrot.lane.b32.xlu0 %v312_v8, %s1803_s28 }
 0x196   : > { %v321_v11 = vpop.permute.xlu1 %320  ;;  %v315_v12 = vpop.permute.xlu0 %314 }
 0x19a   : > { %v324_v13 = vpop.permute.xlu1 %323  ;;  %v318_v14 = vpop.permute.xlu0 %317 }
 0x19b   : > { %v343_v28 = vcombine.low %v312_v8, %v324_v13 }
 0x19d   : > { %v350_v35 = vrot.slane %v343_v28, %v1977_v27 }
 0x19e   : > { %v330_v18 = vpop.permute.xlu1 %329  ;;  %v327_v19 = vpop.permute.xlu0 %326 }
 0x19f   : > { %v351_v24 = vcombine.low %v318_v14, %v330_v18  ;;  %v411_v32 = vcombine.low %v315_v12, %v327_v19 }
 0x1a1   : > { %v358_v31 = vrot.slane %v351_v24, %v1977_v27  ;;  %v418_v44 = vrot.slane %v411_v32, %v1977_v27 }
 0x1a2   : > { %v336_v25 = vpop.permute.xlu1 %335  ;;  %v333_v26 = vpop.permute.xlu0 %332 }
 0x1a3   : > { %v419_v30 = vcombine.low %v321_v11, %v333_v26  ;;  %v366_v36 = vrot.slane %v336_v25, %v1977_v27  ;;  %v375_v40 = vcombine.low %v350_v35, %v358_v31  ;;  %v376_v41 = vcombine.high %v350_v35, %v358_v31 }
 0x1a5   : > { %v426_v39 = vrot.slane %v419_v30, %v1977_v27  ;;  %v383_v52 = vrot.slane %v375_v40, %v1983_v38  ;;  %v390_v53 = vrot.slane %v376_v41, %v1983_v38 }
 0x1a6   : > { %v340_v33 = vpop.permute.xlu1 %339  ;;  %v338_v34 = vpop.permute.xlu0 %337 }
 0x1a7   : > { %v374_v37 = vrot.slane %v340_v33, %v1977_v27  ;;  %v443_v49 = vcombine.low %v418_v44, %v426_v39  ;;  %v444_v50 = vcombine.high %v418_v44, %v426_v39  ;;  %v434_v51 = vrot.slane %v338_v34, %v1977_v27 }
 0x1a9   : > { %v391_v42 = vcombine.low %v366_v36, %v374_v37  ;;  %v392_v43 = vcombine.high %v366_v36, %v374_v37  ;;  %v451_v60 = vrot.slane %v443_v49, %v1983_v38  ;;  %v458_v61 = vrot.slane %v444_v50, %v1983_v38 }
 0x1aa   : > { %v342_v45 = vpop.permute.xlu0 %341 }
 0x1ab   : > { %v399_v46 = vrot.slane %v391_v42, %v1983_v38  ;;  %v406_v47 = vrot.slane %v392_v43, %v1983_v38  ;;  %v442_v48 = vrot.slane %v342_v45, %v1977_v27 }
 0x1ad   : > { %v459_v54 = vcombine.low %v434_v51, %v442_v48  ;;  %v460_v55 = vcombine.high %v434_v51, %v442_v48  ;;  %v407_v56 = vcombine.low %v383_v52, %v399_v46  ;;  %v408_v57 = vcombine.high %v383_v52, %v399_v46 }
 0x1ae   : > { %v409_v58 = vcombine.low %v390_v53, %v406_v47  ;;  %v410_v59 = vcombine.high %v390_v53, %v406_v47  ;;  %v1806_v52 = vmov 0  }
 0x1af   : > { %v467_v62 = vrot.slane %v459_v54, %v1983_v38  ;;  %v474_v63 = vrot.slane %v460_v55, %v1983_v38  ;;  %v483_v5 = vshrl.u32 %v407_v56, 16  ;;  %v491_v6 = vshrl.u32 %v408_v57, 16 }
 0x1b0   : > { %v499_v7 = vshrl.u32 %v409_v58, 16  ;;  %v507_v8 = vshrl.u32 %v410_v59, 16 }
 0x1b1   : > { %v475_v1 = vcombine.low %v451_v60, %v467_v62  ;;  %v476_v2 = vcombine.high %v451_v60, %v467_v62  ;;  %v477_v3 = vcombine.low %v458_v61, %v474_v63  ;;  %v478_v4 = vcombine.high %v458_v61, %v474_v63 }
 0x1b3   : > { %v481_v9 = vpack.i.b16 %v475_v1, %v407_v56  ;;  %v484_v10 = vshrl.u32 %v475_v1, 16  ;;  %v489_v11 = vpack.i.b16 %v476_v2, %v408_v57  ;;  %v492_v12 = vshrl.u32 %v476_v2, 16 }
 0x1b4   : > { %v497_v13 = vpack.i.b16 %v477_v3, %v409_v58  ;;  %v500_v14 = vshrl.u32 %v477_v3, 16  ;;  %v505_v15 = vpack.i.b16 %v478_v4, %v410_v59  ;;  %v508_v16 = vshrl.u32 %v478_v4, 16 }
 0x1b5   : > { %v485_v17 = vpack.i.b16 %v484_v10, %v483_v5  ;;  %v493_v18 = vpack.i.b16 %v492_v12, %v491_v6 }
 0x1b6   : > { %v501_v19 = vpack.i.b16 %v500_v14, %v499_v7  ;;  %v509_v20 = vpack.i.b16 %v508_v16, %v507_v8  ;;  %v511_v21 = vcombine.low %v481_v9, %v497_v13  ;;  %v512_v22 = vcombine.high %v481_v9, %v497_v13 }
 0x1b7   : > { %v527_v23 = vcombine.low %v489_v11, %v505_v15  ;;  %v528_v24 = vcombine.high %v489_v11, %v505_v15 }
 0x1b8   : > { %v570_v25 = vcombine.low %v485_v17, %v501_v19  ;;  %v571_v26 = vcombine.high %v485_v17, %v501_v19  ;;  %v586_v28 = vcombine.low %v493_v18, %v509_v20  ;;  %v587_v29 = vcombine.high %v493_v18, %v509_v20 }
 0x1b9   : > { %v519_v30 = vrot.slane %v511_v21, %v1977_v27  ;;  %v535_v31 = vrot.slane %v527_v23, %v1977_v27  ;;  %v526_v32 = vrot.slane %v512_v22, %v1977_v27  ;;  %v542_v33 = vrot.slane %v528_v24, %v1977_v27 }
 0x1ba   : > { %v578_v34 = vrot.slane %v570_v25, %v1977_v27  ;;  %v594_v35 = vrot.slane %v586_v28, %v1977_v27  ;;  %v585_v39 = vrot.slane %v571_v26, %v1977_v27  ;;  %v601_v40 = vrot.slane %v587_v29, %v1977_v27 }
 0x1bb   : > { %v543_v36 = vcombine.low %v519_v30, %v535_v31  ;;  %v544_v37 = vcombine.high %v519_v30, %v535_v31  ;;  %v559_v46 = vcombine.low %v526_v32, %v542_v33 }
 0x1bc   : > { %v602_v41 = vcombine.low %v578_v34, %v594_v35  ;;  %v603_v42 = vcombine.high %v578_v34, %v594_v35  ;;  %v618_v48 = vcombine.low %v585_v39, %v601_v40 }
 0x1bd   : > { %v558_v43 = vrot.slane %v544_v37, %v1983_v38  ;;  %v551_v47 = vrot.slane %v543_v36, %v1983_v38  ;;  %v566_v57 = vrot.slane %v559_v46, %v1983_v38 }
 0x1be   : > { %v617_v44 = vrot.slane %v603_v42, %v1983_v38  ;;  %v610_v45 = vrot.slane %v602_v41, %v1983_v38  ;;  %v625_v58 = vrot.slane %v618_v48, %v1983_v38 }
 0x1bf   : > { %v648_v50 = vshrl.u32 %v558_v43, 16  ;;  %v568_v54 = vcombine.high %v558_v43, %v1806_v52  ;;  %v633_v61 = vshrl.u32 %v551_v47, 16  ;;  %v2015_v4 = vcombine.high %v566_v57, %v1806_v52 }
 0x1c0   : > { %v647_v49 = vpack.i.b16 %v617_v44, %v558_v43  ;;  %v649_v51 = vshrl.u32 %v617_v44, 16  ;;  %v627_v53 = vcombine.high %v617_v44, %v1806_v52  ;;  %v634_v56 = vshrl.u32 %v610_v45, 16 }
 0x1c1   : > { %v631_v60 = vpack.i.b16 %v610_v45, %v551_v47  ;;  %v654_v63 = vshrl.u32 %v568_v54, 16  ;;  %v626_v3 = vcombine.high %v610_v45, %v1806_v52  ;;  %v2017_v5 = vcombine.high %v625_v58, %v1806_v52 }
 0x1c2   : > { %v678_v27 = vsel %vm673_vm2, %v647_v49, 0  ;;  %v650_v55 = vpack.i.b16 %v649_v51, %v648_v50  ;;  %v655_v62 = vshrl.u32 %v627_v53, 16  ;;  %v653_v1 = vpack.i.b16 %v627_v53, %v568_v54 }
 0x1c3   : > { %1462 = vmatpush3.bf16.xpose.msra.mxu1 %v678_v27  ;;  %v635_v2 = vpack.i.b16 %v634_v56, %v633_v61  ;;  %v669_v6 = vmul.bf16 1052065461, %v631_v60  ;;  %v567_v7 = vcombine.high %v551_v47, %v1806_v52  ;;  %v665_v8 = vpack.i.b16 %v2017_v5, %v2015_v4 }
 0x1c4   : > { %v724_v59 = vsel %vm673_vm2, %v650_v55, 0  ;;  %1473 = vmatprep.subr.bf16.mxu1 %v1791_v0  ;;  %v656_v38 = vpack.i.b16 %v655_v62, %v654_v63  ;;  %v666_v9 = vshrl.u32 %v2015_v4, 16  ;;  %v667_v10 = vshrl.u32 %v2017_v5, 16  ;;  %v1095_v4 = vld [vmem:[#allocation7] sm:$0xf] }
 0x1c5   : > { %1468 = vmatpush3.bf16.xpose.msra.mxu0 %v724_v59  ;;  %v770_v11 = vsel %vm673_vm2, %v653_v1, 0  ;;  %v670_v12 = vmul.bf16 1052065461, %v635_v2  ;;  %v642_v13 = vshrl.u32 %v626_v3, 16  ;;  %v639_v16 = vpack.i.b16 %v626_v3, %v567_v7 }
 0x1c6   : > { %1479 = vmatprep.subr.bf16.mxu0 %v1791_v0  ;;  %v2027_v14 = vpack.i.b16 %v667_v10, %v666_v9  ;;  %v816_v15 = vsel %vm673_vm2, %v656_v38, 0  ;;  %v641_v17 = vshrl.u32 %v567_v7, 16  ;;  %v661_v18 = vshrl.u32 %v625_v58, 16 }
 0x1c7   : > { %v659_v19 = vpack.i.b16 %v625_v58, %v566_v57  ;;  %v660_v21 = vshrl.u32 %v566_v57, 16  ;;  %v671_v22 = vmul.bf16 1052065461, %v639_v16 }
 0x1c8   : > { %v643_v20 = vpack.i.b16 %v642_v13, %v641_v17  ;;  %v1003_v17 = vsel %vm909_vm3, %v665_v8, 0 }
 0x1c9   : > { %v662_v23 = vpack.i.b16 %v661_v18, %v660_v21  ;;  %v911_v24 = vsel %vm909_vm3, %v659_v19, 0  ;;  %v1049_v19 = vsel %vm909_vm3, %v2027_v14, 0  ;;  %v1096_v21 = vld [vmem:[#allocation7 + $0x4] sm:$0xf] }
 0x1ca   : > { %1464 = vmatmul.mubr.msk.bf16.vlgmr.msra.gmra.mxu1 %vm673_vm2, %v669_v6  ;;  %v672_v25 = vmul.bf16 1052065461, %v643_v20 }
 0x1cb   : > { %1474 = vmatpush3.bf16.xpose.msra.mxu1 %v770_v11  ;;  %1475 = vmatprep.mubr.msk.bf16.mxu1 %vm1792_vm0, %v1791_v0  ;;  %v957_v26 = vsel %vm909_vm3, %v662_v23, 0 }
 0x1cc   : > { %1470 = vmatmul.mubr.msk.bf16.vlgmr.msra.gmra.mxu0 %vm673_vm2, %v670_v12  ;;  %1485 = vmatprep.subr.bf16.mxu1 %v1791_v0 }
 0x1cd   : > { %1480 = vmatpush3.bf16.xpose.msra.mxu0 %v816_v15  ;;  %1481 = vmatprep.mubr.msk.bf16.mxu0 %vm1792_vm0, %v1791_v0 }
 0x1ce   : > { %1491 = vmatprep.subr.bf16.mxu0 %v1791_v0 }
 0x1d2   : > { %1476 = vmatmul.mubr.msk.bf16.vlgmr.msra.gmra.mxu1 %vm673_vm2, %v671_v22 }
 0x1d3   : > { %1486 = vmatpush3.bf16.msra.mxu1 %v911_v24  ;;  %1487 = vmatprep.mubr.msk.bf16.mxu1 %vm1792_vm0, %v1791_v0  ;;  %v1103_v24 = vsel %vm909_vm3, %v1095_v4, 0 }
 0x1d4   : > { %1482 = vmatmul.mubr.msk.bf16.vlgmr.msra.gmra.mxu0 %vm673_vm2, %v672_v25  ;;  %1497 = vmatprep.subr.bf16.mxu1 %v1791_v0  ;;  %v1149_v25 = vsel %vm909_vm3, %v1096_v21, 0 }
 0x1d5   : > { %1492 = vmatpush3.bf16.msra.mxu0 %v957_v26  ;;  %1493 = vmatprep.mubr.msk.bf16.mxu0 %vm1792_vm0, %v1791_v0  ;;  %v1097_v26 = vld [vmem:[#allocation7 + $0x8] sm:$0xf] }
 0x1d6   : > { %1503 = vmatprep.subr.bf16.mxu0 %v1791_v0 }
 0x28a   : > { %v714_v28 = vpop.f32.mrf.mxu1 }
 0x28b   : > { %v858_v29 = vsel %vm673_vm2, %v714_v28, -inf }
 0x28c   : > { %859 = vmax.xlane.f32.xlu1 %v858_v29  ;;  %v1465_v30 = vpop.f32.mrf.mxu1  ;;  %v760_v31 = vpop.f32.mrf.mxu0  ;;  %v1098_v29 = vld [vmem:[#allocation7 + $0xc] sm:$0xf] }
 0x28d   : > { %v861_v32 = vsel %vm673_vm2, %v760_v31, -inf }
 0x28e   : > { %v717_v33 = vpop.f32.mrf.mxu1  ;;  %862 = vmax.xlane.f32.xlu0 %v861_v32  ;;  %v1471_v34 = vpop.f32.mrf.mxu0 }
 0x290   : > { %v1466_v35 = vpop.f32.mrf.mxu1  ;;  %v763_v36 = vpop.f32.mrf.mxu0 }
 0x291   : > { %v1241_v35 = vsel %vm909_vm3, %v1098_v29, 0 }
 0x292   : > { %v1472_v37 = vpop.f32.mrf.mxu0  ;;  %v806_v39 = vpop.f32.mrf.mxu1 }
 0x293   : > { %v864_v40 = vsel %vm673_vm2, %v806_v39, -inf }
 0x294   : > { %v1477_v41 = vpop.f32.mrf.mxu1  ;;  %865 = vmax.xlane.f32.xlu0 %v864_v40  ;;  %v852_v42 = vpop.f32.mrf.mxu0 }
 0x295   : > { %v867_v43 = vsel %vm673_vm2, %v852_v42, -inf }
 0x296   : > { %v809_v44 = vpop.f32.mrf.mxu1  ;;  %868 = vmax.xlane.f32.xlu1 %v867_v43  ;;  %v1483_v45 = vpop.f32.mrf.mxu0 }
 0x298   : > { %v1478_v46 = vpop.f32.mrf.mxu1  ;;  %v855_v47 = vpop.f32.mrf.mxu0 }
 0x29a   : > { %v1484_v48 = vpop.f32.mrf.mxu0 }
 0x315   : > { %v860_v49 = vpop.xlane.xlu1 %859 }
 0x316   : > { %v870_v50 = vsub.f32 %v714_v28, %v860_v49 }
 0x317   : > { %v863_v51 = vpop.xlane.xlu0 %862 }
 0x318   : > { %v874_v52 = vmul.f32 1.442695, %v870_v50  ;;  %v871_v53 = vsub.f32 %v760_v31, %v863_v51  ;;  %v1195_v31 = vsel %vm909_vm3, %v1097_v26, 0 }
 0x31a   : > { %1620 = vpow2.f32 %v874_v52  ;;  %v876_v54 = vmul.f32 1.442695, %v871_v53 }
 0x31c   : > { %1622 = vpow2.f32 %v876_v54 }
 0x31d   : > { %v866_v27 = vpop.xlane.xlu0 %865 }
 0x31e   : > { %v872_v55 = vsub.f32 %v806_v39, %v866_v27 }
 0x31f   : > { %v869_v56 = vpop.xlane.xlu1 %868 }
 0x320   : > { %v878_v57 = vmul.f32 1.442695, %v872_v55  ;;  %v873_v58 = vsub.f32 %v852_v42, %v869_v56 }
 0x322   : > { %1624 = vpow2.f32 %v878_v57  ;;  %v880_v59 = vmul.f32 1.442695, %v873_v58 }
 0x324   : > { %1626 = vpow2.f32 %v880_v59 }
 0x327   : > { %v1621_v60 = vpop.eup %1620 }
 0x328   : > { %v882_v61 = vsel %vm673_vm2, %v1621_v60, 0.0 }
 0x329   : > { %v1623_v62 = vpop.eup %1622  ;;  %883 = vadd.xlane.f32.xlu0 %v882_v61 }
 0x32a   : > { %v885_v63 = vsel %vm673_vm2, %v1623_v62, 0.0 }
 0x32b   : > { %886 = vadd.xlane.f32.xlu1 %v885_v63 }
 0x32f   : > { %v1625_v1 = vpop.eup %1624 }
 0x330   : > { %v888_v2 = vsel %vm673_vm2, %v1625_v1, 0.0 }
 0x331   : > { %v1627_v3 = vpop.eup %1626  ;;  %889 = vadd.xlane.f32.xlu0 %v888_v2 }
 0x332   : > { %v891_v6 = vsel %vm673_vm2, %v1627_v3, 0.0 }
 0x333   : > { %892 = vadd.xlane.f32.xlu1 %v891_v6 }
 0x3b2   : > { %v884_v38 = vpop.xlane.xlu0 %883 }
 0x3b3   : > { %1628 = vrcp.f32 %v884_v38 }
 0x3b4   : > { %v887_v7 = vpop.xlane.xlu1 %886 }
 0x3b5   : > { %1630 = vrcp.f32 %v887_v7 }
 0x3ba   : > { %v890_v9 = vpop.xlane.xlu0 %889 }
 0x3bb   : > { %1632 = vrcp.f32 %v890_v9 }
 0x3bc   : > { %v893_v10 = vpop.xlane.xlu1 %892 }
 0x3bd   : > { %1634 = vrcp.f32 %v893_v10 }
 0x3c0   : > { %v1629_v11 = vpop.eup %1628 }
 0x3c1   : > { %v898_v12 = vmul.f32 %v1629_v11, %v1621_v60 }
 0x3c2   : > { %v1631_v13 = vpop.eup %1630 }
 0x3c3   : > { %v902_v15 = vpack.c.bf16 %v898_v12, %v898_v12  ;;  %v899_v16 = vmul.f32 %v1631_v13, %v1623_v62 }
 0x3c5   : > { %1488 = vmatmul.mubr.msk.bf16.vlgmr.msra.gmra.mxu1 %vm673_vm2, %v902_v15  ;;  %v903_v18 = vpack.c.bf16 %v899_v16, %v899_v16 }
 0x3c6   : > { %1498 = vmatpush3.bf16.msra.mxu1 %v1003_v17  ;;  %1499 = vmatprep.mubr.msk.bf16.mxu1 %vm1792_vm0, %v1791_v0 }
 0x3c7   : > { %1494 = vmatmul.mubr.msk.bf16.vlgmr.msra.gmra.mxu0 %vm673_vm2, %v903_v18  ;;  %1509 = vmatprep.subr.bf16.mxu1 %v1791_v0 }
 0x3c8   : > { %v1633_v20 = vpop.eup %1632  ;;  %1504 = vmatpush3.bf16.msra.mxu0 %v1049_v19  ;;  %1505 = vmatprep.mubr.msk.bf16.mxu0 %vm1792_vm0, %v1791_v0 }
 0x3c9   : > { %v900_v5 = vmul.f32 %v1633_v20, %v1625_v1  ;;  %1515 = vmatprep.subr.bf16.mxu0 %v1791_v0 }
 0x3ca   : > { %v1635_v8 = vpop.eup %1634 }
 0x3cb   : > { %v904_v22 = vpack.c.bf16 %v900_v5, %v900_v5  ;;  %v901_v23 = vmul.f32 %v1635_v8, %v1627_v3 }
 0x3cd   : > { %1500 = vmatmul.mubr.msk.bf16.vlgmr.msra.gmra.mxu1 %vm673_vm2, %v904_v22  ;;  %v905_v14 = vpack.c.bf16 %v901_v23, %v901_v23 }
 0x3ce   : > { %1510 = vmatpush3.bf16.msra.mxu1 %v1103_v24  ;;  %1511 = vmatprep.mubr.msk.bf16.mxu1 %vm1792_vm0, %v1791_v0 }
 0x3cf   : > { %1506 = vmatmul.mubr.msk.bf16.vlgmr.msra.gmra.mxu0 %vm673_vm2, %v905_v14  ;;  %1521 = vmatprep.subr.bf16.mxu1 %v1791_v0 }
 0x3d0   : > { %1516 = vmatpush3.bf16.msra.mxu0 %v1149_v25  ;;  %1517 = vmatprep.mubr.msk.bf16.mxu0 %vm1792_vm0, %v1791_v0 }
 0x3d1   : > { %1527 = vmatprep.subr.bf16.mxu0 %v1791_v0 }
 0x485   : > { %v947_v28 = vpop.f32.mrf.mxu1 }
 0x486   : > { %v1091_v30 = vpack.c.bf16 %v947_v28, %v947_v28 }
 0x487   : > { %v1489_v32 = vpop.f32.mrf.mxu1  ;;  %v993_v33 = vpop.f32.mrf.mxu0 }
 0x488   : > { %v1092_v34 = vpack.c.bf16 %v993_v33, %v993_v33  ;;  %1512 = vmatmul.mubr.msk.bf16.vlgmr.msra.gmra.mxu1 %vm673_vm2, %v1091_v30 }
 0x489   : > { %v950_v36 = vpop.f32.mrf.mxu1  ;;  %v1495_v37 = vpop.f32.mrf.mxu0  ;;  %1522 = vmatpush3.bf16.msra.mxu1 %v1195_v31  ;;  %1523 = vmatprep.mubr.msk.bf16.mxu1 %vm1792_vm0, %v1791_v0 }
 0x48a   : > { %1518 = vmatmul.mubr.msk.bf16.vlgmr.msra.gmra.mxu0 %vm673_vm2, %v1092_v34 }
 0x48b   : > { %v1490_v39 = vpop.f32.mrf.mxu1  ;;  %v996_v40 = vpop.f32.mrf.mxu0  ;;  %1528 = vmatpush3.bf16.msra.mxu0 %v1241_v35  ;;  %1529 = vmatprep.mubr.msk.bf16.mxu0 %vm1792_vm0, %v1791_v0 }
 0x48d   : > { %v1496_v41 = vpop.f32.mrf.mxu0  ;;  %v1039_v42 = vpop.f32.mrf.mxu1 }
 0x48e   : > { %v1093_v43 = vpack.c.bf16 %v1039_v42, %v1039_v42 }
 0x48f   : > { %v1501_v44 = vpop.f32.mrf.mxu1  ;;  %v1085_v45 = vpop.f32.mrf.mxu0 }
 0x490   : > { %v1094_v46 = vpack.c.bf16 %v1085_v45, %v1085_v45  ;;  %1524 = vmatmul.mubr.msk.bf16.vlgmr.msra.gmra.mxu1 %vm673_vm2, %v1093_v43 }
 0x491   : > { %v1042_v47 = vpop.f32.mrf.mxu1  ;;  %v1507_v48 = vpop.f32.mrf.mxu0 }
 0x492   : > { %1530 = vmatmul.mubr.msk.bf16.vlgmr.msra.gmra.mxu0 %vm673_vm2, %v1094_v46 }
 0x493   : > { %v1502_v49 = vpop.f32.mrf.mxu1  ;;  %v1088_v50 = vpop.f32.mrf.mxu0 }
 0x495   : > { %v1508_v51 = vpop.f32.mrf.mxu0 }
 0x548   : > { %v1139_v52 = vpop.f32.mrf.mxu1 }
 0x549   : > { %v1283_v58 = vsel %vm268_vm1, %v1139_v52, 0.0 }
 0x54a   : > { %v1513_v53 = vpop.f32.mrf.mxu1  ;;  %v1185_v0 = vpop.f32.mrf.mxu0 }
 0x54b   : > { %v1284_v55 = vsel %vm268_vm1, %v1185_v0, 0.0 }
 0x54c   : > { %v1142_v54 = vpop.f32.mrf.mxu1  ;;  %v1519_v27 = vpop.f32.mrf.mxu0  ;;  %v1285_v59 = vadd.f32 %v1284_v55, %v1283_v58 }
 0x54e   : > { %v1514_v56 = vpop.f32.mrf.mxu1  ;;  %v1188_v57 = vpop.f32.mrf.mxu0 }
 0x550   : > { %v1520_v60 = vpop.f32.mrf.mxu0  ;;  %v1231_v61 = vpop.f32.mrf.mxu1 }
 0x551   : > { %v1286_v62 = vsel %vm268_vm1, %v1231_v61, 0.0 }
 0x552   : > { %v1287_v63 = vadd.f32 %v1286_v62, %v1285_v59  ;;  %v1525_v1 = vpop.f32.mrf.mxu1  ;;  %v1277_v2 = vpop.f32.mrf.mxu0 }
 0x553   : > { %v1288_v3 = vsel %vm268_vm1, %v1277_v2, 0.0 }
 0x554   : > { %v1289_v6 = vadd.f32 %v1288_v3, %v1287_v63  ;;  %v1234_v38 = vpop.f32.mrf.mxu1  ;;  %v1531_v7 = vpop.f32.mrf.mxu0 }
 0x556   : > { %v1526_v9 = vpop.f32.mrf.mxu1  ;;  %v1280_v10 = vpop.f32.mrf.mxu0  ;;  %1290 = vst.msk [vmem:[%s241_s10] sm:$0xff] %vm268_vm1, %v1289_v6 }
 0x557   : > { %1729 = shalt.err (!%p1726_p9)
}
 0x558   : > { %s1730_s25 = scalar_lea.hbm %s2096_s5, 128  ;;  %s1734_s24 = scalar_lea.hbm %s2144_s4, 256 }
 0x559   : > { %p1731_p13 = scmp.ne.s32.totalorder %s2096_s5, %s1730_s25  ;;  %p1735_p0 = scmp.lt.s32.totalorder %s2096_s5, %s2144_s4 }
 0x55a   : > { %p1736_p4 = scmp.lt.s32.totalorder %s1734_s24, %s1730_s25 }
 0x55b   : > { %p1732_p5 = pnand %p1731_p13, %p2160_p11 }
 0x55c   : > { %p1737_p8 = por %p1736_p4, %p1735_p0 }
 0x55d   : > { %p1733_p10 = pneg %p1732_p5 }
 0x55f   : > { %p1738_p3 = pnand %p1737_p8, %p1733_p10 }
 0x561   : > { %1741 = shalt.err (!%p1738_p3)
}
 0x562   : > { %1543 = dma.vmem_to_hbm [thread:$0]  (%p2160_p11), %s2098_s21, 128, %s2096_s5, %s1292_s19   ;;  %v1532_v11 = vpop.f32.mrf.mxu0 }
 0x563 PF: > { %s1317_s8 = sand.u32 1, %s1772_s15   ;;  %p2161_p1 = scmp.ne.s32.totalorder %s2150_s22, 0 }
 0x564   : > { %p2162_p2 = scmp.ge.s32.totalorder %s1784_s18, 2  ;;  %s1318_s9 = scalar_lea.sflag [#allocation4], %s1317_s8 }
 0x566   : > { %p1557_p6 = pnand %p2162_p2, %p2161_p1 }
 0x568   : > { %p1558_p12 = pneg %p1557_p6 }
 0x56a   : > { %1767 = dma.done.wait (%p1558_p12), %s1318_s9, 128  }
 0x56b   : > { %1769 = vsyncadd (%p1558_p12), %s1318_s9, 4294967168  ;;  %p18_p7 = scmp.ge.s32.totalorder %s1905_s11, 4   ;;  %s2163_s15 = smov %s1776_s16 }
 0x56c   : > { %s2164_s16 = smov %s1780_s17  ;;  %s2165_s17 = smov %s1921_s20 }
 0x56d   : > { %s2166_s18 = smov %s1905_s11  ;;  %20 = sbr.rel (!%p18_p7) target bundleno = 6 (0x6), region = 89 }
 0x572   :  { %1323 = vsyncpa [#allocation3], 1 }
 0x573   :  { %1325 = vsyncpa [#allocation3 + $0x1], 1 }
 0x574   :  { %1326 = vsyncpa [#allocation6], 1 }
 0x575   :  { %1327 = vsyncpa [#allocation4], 1 }
 0x576   :  { %1329 = vsyncpa [#allocation4 + $0x1], 1 }

</bundles_post_ra>
